<compile_context>
chip_gen: v5e
topology: v5e:2x2
jax: 0.10.0
libtpu: 0.0.40
codegen_flags: <defaults>
</compile_context>

<pallas_src>
import functools

import jax
import jax.numpy as jnp
from jax.experimental import pallas as pl
from jax.experimental.pallas import tpu as pltpu


def _fused_ff_kernel(x_ref, *refs, n_layers):
    """Fused FeedForward stack.

    refs = (w0, b0, w1, b1, ..., w_{L-1}, b_{L-1}, o_ref)
    wi: (dims[i], dims[i+1])   bi: (1, dims[i+1])   (W stored pre-transposed)
    """
    o_ref = refs[-1]
    params = refs[:-1]

    y = x_ref[...].astype(jnp.float32)
    for i in range(n_layers):
        w = params[2 * i][...]
        b = params[2 * i + 1][...].astype(jnp.float32)
        # MXU op in the parameter dtype (bf16 weights take the fast path),
        # f32 accumulation + bias.
        y = jnp.dot(y.astype(w.dtype), w, preferred_element_type=jnp.float32) + b
        if i < n_layers - 1:
            # swish(x) = x * sigmoid(x); the exp/recip ride the EUP slot under
            # the MXU work, essentially free in-kernel.
            y = y * jax.nn.sigmoid(y)
    o_ref[...] = y.astype(o_ref.dtype)


# Stay below the most conservative default scoped-VMEM window (v5e: 16 MiB)
# without needing any vmem_limit override.
_VMEM_BUDGET = 12 * 1024 * 1024


def _choose_tile_m(dims, x_itemsize, out_itemsize, param_bytes):
    """Pick the largest batch tile whose pipelined buffers fit in VMEM."""
    max_w = max(dims[1:])
    per_row = (2 * x_itemsize * dims[0]        # double-buffered input tile
               + 2 * out_itemsize * dims[-1]   # double-buffered output tile
               + 2 * 4 * max_w)                # headroom for f32 intermediates
    budget = max(_VMEM_BUDGET - 2 * param_bytes, 64 * per_row)
    tm = 512
    while tm > 64 and tm * per_row > budget:
        tm //= 2
    return tm


def feed_forward_pallas(x, weights, biases, out_dtype=None):
    """Run the whole Linear/swish stack in a single pallas_call.

    x: (..., dims[0]); weights[i]: (dims[i], dims[i+1]); biases[i]: (1, dims[i+1]).
    """
    n_layers = len(weights)
    orig_shape = x.shape
    if x.ndim != 2:
        x = x.reshape(-1, orig_shape[-1])
    M, K0 = x.shape
    N_out = weights[-1].shape[1]
    out_dtype = out_dtype or x.dtype
    kernel = functools.partial(_fused_ff_kernel, n_layers=n_layers)

    flat_params = []
    for w, b in zip(weights, biases):
        flat_params.append(w)
        flat_params.append(b)
    param_bytes = sum(int(p.size) * p.dtype.itemsize for p in flat_params)
    dims = [K0] + [w.shape[1] for w in weights]
    tm = _choose_tile_m(dims, x.dtype.itemsize,
                        jnp.dtype(out_dtype).itemsize, param_bytes)

    if M <= tm:
        # Single block, no grid: one invocation, everything VMEM-resident.
        in_specs = [pl.BlockSpec(x.shape, lambda *_: (0, 0))]
        in_specs += [pl.BlockSpec(p.shape, lambda *_: (0, 0))
                     for p in flat_params]
        out = pl.pallas_call(
            kernel,
            out_shape=jax.ShapeDtypeStruct((M, N_out), out_dtype),
            in_specs=in_specs,
            out_specs=pl.BlockSpec((M, N_out), lambda *_: (0, 0)),
        )(x, *flat_params)
    else:
        # Tile over M only.  Weights/biases keep a constant block index
        # (DMA'd once, VMEM-resident across steps); activations are pipelined
        # over the batch axis; partial final block is masked by Pallas.
        in_specs = [pl.BlockSpec((tm, K0), lambda i: (i, 0))]
        in_specs += [pl.BlockSpec(p.shape, lambda i: (0, 0))
                     for p in flat_params]
        out = pl.pallas_call(
            kernel,
            out_shape=jax.ShapeDtypeStruct((M, N_out), out_dtype),
            grid=(pl.cdiv(M, tm),),
            in_specs=in_specs,
            out_specs=pl.BlockSpec((tm, N_out), lambda i: (i, 0)),
            compiler_params=pltpu.CompilerParams(
                dimension_semantics=("parallel",)),
        )(x, *flat_params)

    if len(orig_shape) != 2:
        out = out.reshape(*orig_shape[:-1], N_out)
    return out


class FeedForwardPallas:
    """Mirror of higashi FeedForward: Linear layers with swish in between.

    dropout=None equivalent (inference); `reshape` reproduces
    output.view(output.shape[0], -1, 1).
    """

    def __init__(self, dims, reshape=False, use_bias=True, key=None,
                 dtype=jnp.float32):
        self.dims = tuple(dims)
        self.reshape = reshape
        self.use_bias = use_bias
        if key is None:
            key = jax.random.PRNGKey(0)
        self.weights = []   # stored as (in, out) = W^T relative to PyTorch
        self.biases = []
        for i in range(len(dims) - 1):
            key, wk, bk = jax.random.split(key, 3)
            fan_in = dims[i]
            bound = 1.0 / (fan_in ** 0.5)
            w = jax.random.uniform(wk, (dims[i], dims[i + 1]),
                                   minval=-bound, maxval=bound, dtype=dtype)
            if use_bias:
                b = jax.random.uniform(bk, (1, dims[i + 1]),
                                       minval=-bound, maxval=bound, dtype=dtype)
            else:
                b = jnp.zeros((1, dims[i + 1]), dtype=dtype)
            self.weights.append(w)
            self.biases.append(b)
        # TODO(synk): training-mode nn.Dropout not implemented (dropout=None path).

    def __call__(self, x):
        out = feed_forward_pallas(x, self.weights, self.biases)
        if self.reshape:
            out = out.reshape(out.shape[0], -1, 1)
        return out


def _reference(x, ff: FeedForwardPallas):
    out = x.reshape(-1, x.shape[-1]).astype(jnp.float32)
    n = len(ff.weights)
    for i in range(n - 1):
        out = out @ ff.weights[i].astype(jnp.float32) + ff.biases[i].astype(jnp.float32)
        out = out * jax.nn.sigmoid(out)
    out = out @ ff.weights[-1].astype(jnp.float32) + ff.biases[-1].astype(jnp.float32)
    out = out.astype(x.dtype).reshape(*x.shape[:-1], ff.dims[-1])
    if ff.reshape:
        out = out.reshape(out.shape[0], -1, 1)
    return out


if __name__ == "__main__":
    key = jax.random.PRNGKey(0)
    kx, kp, kx2 = jax.random.split(key, 3)

    dims = (32, 64, 48, 16)   # two hidden (swish) layers + final linear

    # --- small batch: grid-less fused single-block path ---
    batch = 8
    x = jax.random.normal(kx, (batch, dims[0]), dtype=jnp.float32)
    ff = FeedForwardPallas(dims, reshape=True, use_bias=True, key=kp)

    y = jax.block_until_ready(ff(x))
    y_ref = _reference(x, ff)
    assert y.shape == (batch, dims[-1], 1), y.shape
    assert jnp.allclose(y, y_ref, atol=1e-4, rtol=1e-4), "small-batch mismatch"

    # --- large batch: M-tiled path (weights resident, partial last block) ---
    big_batch = 1000   # not a multiple of the tile -> exercises masked edge block
    x_big = jax.random.normal(kx2, (big_batch, dims[0]), dtype=jnp.float32)
    ff2 = FeedForwardPallas(dims, reshape=False, use_bias=True, key=kp)

    y_big = jax.block_until_ready(ff2(x_big))
    y_big_ref = _reference(x_big, ff2)
    assert y_big.shape == (big_batch, dims[-1]), y_big.shape
    assert jnp.allclose(y_big, y_big_ref, atol=1e-4, rtol=1e-4), \
        "large-batch mismatch"

    print("KERNEL_OK")
</pallas_src>

<mosaic_0001>
module attributes {stable_mosaic.version = 11 : i64} {
  func.func @_fused_ff_kernel(%arg0: memref<8x32xf32, #tpu.memory_space<vmem>>, %arg1: memref<32x64xf32, #tpu.memory_space<vmem>>, %arg2: memref<1x64xf32, #tpu.memory_space<vmem>>, %arg3: memref<64x48xf32, #tpu.memory_space<vmem>>, %arg4: memref<1x48xf32, #tpu.memory_space<vmem>>, %arg5: memref<48x16xf32, #tpu.memory_space<vmem>>, %arg6: memref<1x16xf32, #tpu.memory_space<vmem>>, %arg7: memref<8x16xf32, #tpu.memory_space<vmem>>) attributes {dimension_semantics = [], scalar_prefetch = 0 : i64, scratch_operands = 0 : i64, tpu.core_type = #tpu.core_type<tc>} {
    %c0 = arith.constant 0 : index
    %c0_0 = arith.constant 0 : index
    %0 = vector.load %arg0[%c0, %c0_0] : memref<8x32xf32, #tpu.memory_space<vmem>>, vector<8x32xf32>
    %c0_1 = arith.constant 0 : index
    %c0_2 = arith.constant 0 : index
    %1 = vector.load %arg1[%c0_1, %c0_2] : memref<32x64xf32, #tpu.memory_space<vmem>>, vector<32x64xf32>
    %c0_3 = arith.constant 0 : index
    %c0_4 = arith.constant 0 : index
    %2 = vector.load %arg2[%c0_3, %c0_4] : memref<1x64xf32, #tpu.memory_space<vmem>>, vector<1x64xf32>
    %cst = arith.constant dense<0.000000e+00> : vector<8x64xf32>
    %3 = tpu.matmul %0, %1, %cst {dimension_numbers = #tpu.dot_dimension_numbers<[1], [0], [0], [1], [0, 0, 1, 1], [], []>} : vector<8x32xf32>, vector<32x64xf32>, vector<8x64xf32> -> vector<8x64xf32>
    %4 = vector.broadcast %2 : vector<1x64xf32> to vector<8x64xf32>
    %5 = arith.addf %3, %4 : vector<8x64xf32>
    %6 = arith.negf %5 : vector<8x64xf32>
    %7 = math.exp %6 : vector<8x64xf32>
    %cst_5 = arith.constant 1.000000e+00 : f32
    %8 = vector.broadcast %cst_5 : f32 to vector<8x64xf32>
    %9 = arith.addf %8, %7 : vector<8x64xf32>
    %10 = arith.divf %8, %9 : vector<8x64xf32>
    %11 = arith.mulf %5, %10 : vector<8x64xf32>
    %c0_6 = arith.constant 0 : index
    %c0_7 = arith.constant 0 : index
    %12 = vector.load %arg3[%c0_6, %c0_7] : memref<64x48xf32, #tpu.memory_space<vmem>>, vector<64x48xf32>
    %c0_8 = arith.constant 0 : index
    %c0_9 = arith.constant 0 : index
    %13 = vector.load %arg4[%c0_8, %c0_9] : memref<1x48xf32, #tpu.memory_space<vmem>>, vector<1x48xf32>
    %cst_10 = arith.constant dense<0.000000e+00> : vector<8x48xf32>
    %14 = tpu.matmul %11, %12, %cst_10 {dimension_numbers = #tpu.dot_dimension_numbers<[1], [0], [0], [1], [0, 0, 1, 1], [], []>} : vector<8x64xf32>, vector<64x48xf32>, vector<8x48xf32> -> vector<8x48xf32>
    %15 = vector.broadcast %13 : vector<1x48xf32> to vector<8x48xf32>
    %16 = arith.addf %14, %15 : vector<8x48xf32>
    %17 = arith.negf %16 : vector<8x48xf32>
    %18 = math.exp %17 : vector<8x48xf32>
    %cst_11 = arith.constant 1.000000e+00 : f32
    %19 = vector.broadcast %cst_11 : f32 to vector<8x48xf32>
    %20 = arith.addf %19, %18 : vector<8x48xf32>
    %21 = arith.divf %19, %20 : vector<8x48xf32>
    %22 = arith.mulf %16, %21 : vector<8x48xf32>
    %c0_12 = arith.constant 0 : index
    %c0_13 = arith.constant 0 : index
    %23 = vector.load %arg5[%c0_12, %c0_13] : memref<48x16xf32, #tpu.memory_space<vmem>>, vector<48x16xf32>
    %c0_14 = arith.constant 0 : index
    %c0_15 = arith.constant 0 : index
    %24 = vector.load %arg6[%c0_14, %c0_15] : memref<1x16xf32, #tpu.memory_space<vmem>>, vector<1x16xf32>
    %cst_16 = arith.constant dense<0.000000e+00> : vector<8x16xf32>
    %25 = tpu.matmul %22, %23, %cst_16 {dimension_numbers = #tpu.dot_dimension_numbers<[1], [0], [0], [1], [0, 0, 1, 1], [], []>} : vector<8x48xf32>, vector<48x16xf32>, vector<8x16xf32> -> vector<8x16xf32>
    %26 = vector.broadcast %24 : vector<1x16xf32> to vector<8x16xf32>
    %27 = arith.addf %25, %26 : vector<8x16xf32>
    %c0_17 = arith.constant 0 : index
    %c0_18 = arith.constant 0 : index
    %28 = vector.load %arg7[%c0_17, %c0_18] : memref<8x16xf32, #tpu.memory_space<vmem>>, vector<8x16xf32>
    tpu.vector_store %arg7[%c0_17, %c0_18], %27 {strides = array<i32>} : memref<8x16xf32, #tpu.memory_space<vmem>>, vector<8x16xf32>,
    return
  }
}

</mosaic_0001>

<bundles_post_ra>
// kernel: tpu_custom_call.1
= control target key start
LH: loop header
LB: loop body
LE: loop exit
PB: predicated region body
PF: predicated region fallthrough
CT: control target
= control target key end

     0   :  { %s341_s0 = inlined_call_operand.vmem [shape: f32[8,32], index: 0, kind: input, shape index: {}]   ;;  %s342_s1 = inlined_call_operand.vmem [shape: f32[32,64], index: 1, kind: input, shape index: {}]   ;;  %s343_s2 = inlined_call_operand.vmem [shape: f32[1,64], index: 2, kind: input, shape index: {}]   ;;  %s344_s3 = inlined_call_operand.vmem [shape: f32[64,48], index: 3, kind: input, shape index: {}]   ;;  %s345_s4 = inlined_call_operand.vmem [shape: f32[1,48], index: 4, kind: input, shape index: {}]   ;;  %s346_s5 = inlined_call_operand.vmem [shape: f32[48,16], index: 5, kind: input, shape index: {}]   ;;  %s347_s6 = inlined_call_operand.vmem [shape: f32[1,16], index: 6, kind: input, shape index: {}]   ;;  %s348_s7 = inlined_call_operand.hbm [shape: f32[8,16], index: 7, kind: output, shape index: {}]  }
   0x1   :  { %v31_v0 = vld [vmem:[%s342_s1 + $0x18] sm:$0xff]  ;;  %v30_v1 = vld [vmem:[%s342_s1 + $0x10] sm:$0xff]  ;;  %v29_v2 = vld [vmem:[%s342_s1 + $0x8] sm:$0xff] }
   0x2   :  { %52 = vmatpush.msra.mxu0 %v31_v0 }
   0x4   :  { %53 = vmatpush.msra.mxu0 %v30_v1 }
   0x5   :  { %12 = vsyncpa [#allocation3], 0  ;;  %v28_v3 = vld [vmem:[%s342_s1] sm:$0xff]  ;;  %vm36_vm0 = vcmask 261120   ;;  %v87_v5 = vld [vmem:[%s344_s3 + $0x38] sm:$0xff]  ;;  %vm92_vm5 = vcmask 523264  }
   0x6   :  { %54 = vmatpush.msra.mxu0 %v29_v2  ;;  %v27_v4 = vld [vmem:[%s341_s0] sm:$0xff]  ;;  %104 = vmatpush.msra.mxu1 %v87_v5  ;;  %v86_v6 = vld [vmem:[%s344_s3 + $0x30] sm:$0xff]  ;;  %v85_v7 = vld [vmem:[%s344_s3 + $0x28] sm:$0xff]  ;;  %vm146_vm10 = vcmask 392192   ;;  %s231_s1 = smov [#allocation2]   ;;  %s179_s18 = sshll.u32 %s348_s7, 4  ;;  %s180_s18 = int_to_ptr.hbm [resolvable:$true] %s179_s18 }
   0x7   :  { %v84_v8 = vld [vmem:[%s344_s3 + $0x20] sm:$0xff]  ;;  %v83_v9 = vld [vmem:[%s344_s3 + $0x18] sm:$0xff]  ;;  %v82_v10 = vld [vmem:[%s344_s3 + $0x10] sm:$0xff]  ;;  %s177_s16 = sshll.u32 %s231_s1, 4  ;;  %vm170_vm11 = vcmask 130048   ;;  %s178_s16 = int_to_ptr.vmem [resolvable:$true] %s177_s16 }
   0x8   :  { %55 = vmatpush.msra.mxu0 %v28_v3  ;;  %105 = vmatpush.msra.mxu1 %v86_v6  ;;  %v194_v11 = vld [vmem:[%s343_s2] ss:$0 sm:$0xff]  ;;  %v81_v12 = vld [vmem:[%s344_s3 + $0x8] sm:$0xff]  ;;  %v139_v32 = vld [vmem:[%s346_s5 + $0x18] sm:$0xff] }
   0x9   :  { %188 = vmatmul.msk.f32.vlgmr.msra.gmra.mxu0 %vm36_vm0, %v27_v4  ;;  %v80_v13 = vld [vmem:[%s344_s3] sm:$0xff]  ;;  %v141_v30 = vld [vmem:[%s346_s5 + $0x28] sm:$0xff]  ;;  %v138_v33 = vld [vmem:[%s346_s5 + $0x10] sm:$0xff] }
   0xa   :  { %106 = vmatpush.msra.mxu1 %v85_v7  ;;  %160 = vmatpush.msra.mxu2 %v141_v30  ;;  %v140_v31 = vld [vmem:[%s346_s5 + $0x20] sm:$0xff]  ;;  %v137_v35 = vld [vmem:[%s346_s5 + $0x8] sm:$0xff] }
   0xb   :  { %v195_v34 = vld [vmem:[%s345_s4] ss:$0 sm:$0xff] }
   0xc   :  { %107 = vmatpush.msra.mxu1 %v84_v8  ;;  %161 = vmatpush.msra.mxu2 %v140_v31  ;;  %v136_v36 = vld [vmem:[%s346_s5] sm:$0xff] }
   0xd   :  { %v196_v53 = vld [vmem:[%s347_s6] ss:$0 sm:$0xff] }
   0xe   :  { %108 = vmatpush.msra.mxu1 %v83_v9  ;;  %162 = vmatpush.msra.mxu2 %v139_v32 }
  0x10   :  { %109 = vmatpush.msra.mxu1 %v82_v10  ;;  %163 = vmatpush.msra.mxu2 %v138_v33 }
  0x12   :  { %110 = vmatpush.msra.mxu1 %v81_v12  ;;  %164 = vmatpush.msra.mxu2 %v137_v35 }
  0x14   :  { %111 = vmatpush.msra.mxu1 %v80_v13  ;;  %165 = vmatpush.msra.mxu2 %v136_v36 }
  0x86   :  { %v57_v14 = vpop.f32.mrf.mxu0 }
  0x87   :  { %v58_v15 = vadd.f32 %v194_v11, %v57_v14 }
  0x89   :  { %v189_v16 = vmul.f32 -1.442695, %v58_v15 }
  0x8b   :  { %197 = vpow2.f32 %v189_v16 }
  0x91   :  { %v198_v17 = vpop.eup %197 }
  0x92   :  { %v63_v18 = vadd.f32 1.0, %v198_v17 }
  0x94   :  { %199 = vrcp.f32 %v63_v18  ;;  %v75_v22 = vand.u32 2147483648, %v63_v18  ;;  %v73_v24 = vand.u32 2147483647, %v63_v18  ;;  %vm69_vm2 = vweird.f32 %v63_v18 }
  0x96   :  { %v76_v26 = vor.u32 1.1754944e-38, %v75_v22  ;;  %vm74_vm4 = vcmp.eq.f32.partialorder %v73_v24, 8.507059e+37 }
  0x9a   :  { %v200_v19 = vpop.eup %199 }
  0x9b   :  { %v65_v20 = vmul.f32 %v200_v19, %v63_v18  ;;  %vm70_vm1 = vweird.f32 %v200_v19 }
  0x9c   :  { %vm71_vm3 = vmor %vm69_vm2, %vm70_vm1 }
  0x9d   :  { %v66_v21 = vsub.f32 1.0, %v65_v20 }
  0x9f   :  { %v67_v23 = vmul.f32 %v200_v19, %v66_v21 }
  0xa1   :  { %v68_v25 = vadd.f32 %v200_v19, %v67_v23 }
  0xa3   :  { %v72_v27 = vsel %vm71_vm3, %v200_v19, %v68_v25 }
  0xa4   :  { %v77_v28 = vsel %vm74_vm4, %v76_v26, %v72_v27 }
  0xa5   :  { %v79_v29 = vmul.f32 %v77_v28, %v58_v15 }
  0xa7   :  { %190 = vmatmul.msk.f32.vlgmr.msra.gmra.mxu1 %vm92_vm5, %v79_v29 }
 0x124   :  { %v113_v37 = vpop.f32.mrf.mxu1 }
 0x125   :  { %v114_v38 = vadd.f32 %v195_v34, %v113_v37 }
 0x127   :  { %v191_v39 = vmul.f32 -1.442695, %v114_v38 }
 0x129   :  { %201 = vpow2.f32 %v191_v39 }
 0x12f   :  { %v202_v40 = vpop.eup %201 }
 0x130   :  { %v119_v41 = vadd.f32 1.0, %v202_v40 }
 0x132   :  { %203 = vrcp.f32 %v119_v41  ;;  %v131_v45 = vand.u32 2147483648, %v119_v41  ;;  %v129_v47 = vand.u32 2147483647, %v119_v41  ;;  %vm125_vm7 = vweird.f32 %v119_v41 }
 0x134   :  { %v132_v49 = vor.u32 1.1754944e-38, %v131_v45  ;;  %vm130_vm9 = vcmp.eq.f32.partialorder %v129_v47, 8.507059e+37 }
 0x138   :  { %v204_v42 = vpop.eup %203 }
 0x139   :  { %v121_v43 = vmul.f32 %v204_v42, %v119_v41  ;;  %vm126_vm6 = vweird.f32 %v204_v42 }
 0x13a   :  { %vm127_vm8 = vmor %vm125_vm7, %vm126_vm6 }
 0x13b   :  { %v122_v44 = vsub.f32 1.0, %v121_v43 }
 0x13d   :  { %v123_v46 = vmul.f32 %v204_v42, %v122_v44 }
 0x13f   :  { %v124_v48 = vadd.f32 %v204_v42, %v123_v46 }
 0x141   :  { %v128_v50 = vsel %vm127_vm8, %v204_v42, %v124_v48 }
 0x142   :  { %v133_v51 = vsel %vm130_vm9, %v132_v49, %v128_v50 }
 0x143   :  { %v135_v52 = vmul.f32 %v133_v51, %v114_v38 }
 0x145   :  { %192 = vmatmul.msk.f32.vlgmr.msra.gmra.mxu2 %vm146_vm10, %v135_v52 }
 0x1c8   :  { %v167_v54 = vpop.f32.mrf.mxu2 }
 0x1c9   :  { %v168_v55 = vadd.f32 %v196_v53, %v167_v54 }
 0x1cb   :  { %171 = vst.msk [vmem:[#allocation2] sm:$0xff] %vm170_vm11, %v168_v55 }
 0x1cc   :  { %182 = dma.vmem_to_hbm [thread:$0]  %s178_s16, 128, %s180_s18, [#allocation3]  }
 0x1cd   :  { %229 = dma.done.wait [#allocation3], 128  }
 0x1ce   :  { %230 = vsyncadd [#allocation3], 4294967168 }
 0x1cf   :  { %187 = vsyncpa [#allocation3], 1 }

</bundles_post_ra>
